<compile_context>
chip_gen: v6e
topology: v6e:2x2x1
jax: 0.10.0
libtpu: 0.0.40
codegen_flags: <defaults>
</compile_context>

<pallas_src>
import functools

import jax
import jax.numpy as jnp
from jax import lax
from jax.experimental import pallas as pl
from jax.experimental.pallas import tpu as pltpu


def _round_up(x: int, m: int) -> int:
    return ((x + m - 1) // m) * m


def _cdiv(a: int, b: int) -> int:
    return (a + b - 1) // b


def _bce_partial_kernel(pw_ref, logits_ref, targets_ref, out_ref, *, B, T):
    """Per-tile partial sums of BCE-with-logits losses.

    Each (i, j) grid point reads one (TB, TT) tile of logits/targets and
    writes a per-lane partial sum of shape (1, TT) to its own output slice.
    Interior tiles run mask-free; edge tiles mask out elements beyond the
    valid (B, T) region (batch edge, ragged tile edge, and the time-dim
    truncation to min(T_logits, T_targets)).
    """
    i = pl.program_id(0)
    j = pl.program_id(1)
    tb, tt = logits_ref.shape

    pw = pw_ref[0, 0]
    pwm1 = pw - 1.0

    def loss_tile():
        x = logits_ref[...].astype(jnp.float32)
        y = targets_ref[...].astype(jnp.float32)
        # Numerically stable softplus(x) = max(x,0) + log1p(exp(-|x|)).
        sp_pos = jnp.maximum(x, 0.0) + jnp.log1p(jnp.exp(-jnp.abs(x)))
        # PyTorch BCEWithLogitsLoss with pos_weight p:
        #   l = p*y*softplus(-x) + (1-y)*softplus(x)
        #     = sp_pos*(1 + (p-1)*y) - p*x*y
        return sp_pos * (1.0 + pwm1 * y) - pw * (x * y)

    interior = jnp.logical_and((i + 1) * tb <= B, (j + 1) * tt <= T)

    @pl.when(interior)
    def _():
        # Fast path: every element of the tile is valid -> no mask work.
        out_ref[...] = jnp.sum(loss_tile(), axis=0, keepdims=True)

    @pl.when(jnp.logical_not(interior))
    def _():
        # Edge path: build the validity mask from 1-D iotas and discard
        # everything (including NaN/Inf from padded-edge garbage) with a
        # single select on the loss.
        row = i * tb + lax.broadcasted_iota(jnp.int32, (tb, 1), 0)
        col = j * tt + lax.broadcasted_iota(jnp.int32, (1, tt), 1)
        valid = jnp.logical_and(row < B, col < T)
        loss = jnp.where(valid, loss_tile(), 0.0)
        out_ref[...] = jnp.sum(loss, axis=0, keepdims=True)


def custom_bce_with_logits_loss(logits, targets, *, pos_weight=1.0,
                                time_dim_mismatch_tol=5,
                                block_rows=512, block_cols=2048):
    """JAX/Pallas equivalent of CustomBCEWithLogitsLoss.forward."""
    if logits.shape[0] != targets.shape[0]:
        raise ValueError(
            f"Batch mismatch: logits {logits.shape} vs targets {targets.shape}")
    if logits.shape != targets.shape:
        if abs(logits.shape[1] - targets.shape[1]) > time_dim_mismatch_tol:
            raise ValueError(
                f"Shape mismatch: logits {logits.shape} vs targets {targets.shape}")

    B = int(logits.shape[0])
    # Truncation to the common time length is done purely via the in-kernel
    # edge mask; no sliced/padded copies of the inputs are materialized.
    T = int(min(logits.shape[1], targets.shape[1]))

    # Tile sizes aligned to the (8, 128) vreg tiling, never larger than the
    # rounded-up array extents.
    tb = min(_round_up(block_rows, 8), _round_up(B, 8))
    tt = min(_round_up(block_cols, 128), _round_up(T, 128))
    gi = _cdiv(B, tb)
    gj = _cdiv(T, tt)

    # Mirror torch: a falsy pos_weight (None / 0.0) means no positive weighting.
    pw = jnp.full((1, 1), float(pos_weight) if pos_weight else 1.0,
                  dtype=jnp.float32)

    kernel = functools.partial(_bce_partial_kernel, B=B, T=T)

    partials = pl.pallas_call(
        kernel,
        out_shape=jax.ShapeDtypeStruct((gi, gj * tt), jnp.float32),
        grid=(gi, gj),
        in_specs=[
            pl.BlockSpec(memory_space=pltpu.MemorySpace.SMEM),  # pos_weight
            pl.BlockSpec((tb, tt), lambda i, j: (i, j)),
            pl.BlockSpec((tb, tt), lambda i, j: (i, j)),
        ],
        out_specs=pl.BlockSpec((1, tt), lambda i, j: (i, j)),
        compiler_params=pltpu.CompilerParams(
            dimension_semantics=("parallel", "parallel"),
            # 4 MiB/input f32 tiles, double-buffered (16 MiB) + tiny output
            # comfortably fit under an explicit 32 MiB scoped-VMEM limit on
            # v5e/v6e/v7x.
            vmem_limit_bytes=32 * 1024 * 1024),
    )(pw, logits, targets)

    # Mean reduction over the (truncated, unpadded) B*T elements.
    return jnp.sum(partials) / jnp.float32(B * T)


def _reference_loss(logits, targets, pos_weight):
    x = logits.astype(jnp.float32)
    y = targets.astype(jnp.float32)
    sp_pos = jnp.maximum(x, 0.0) + jnp.log1p(jnp.exp(-jnp.abs(x)))
    sp_neg = sp_pos - x
    pw = float(pos_weight) if pos_weight else 1.0
    return jnp.mean(pw * y * sp_neg + (1.0 - y) * sp_pos)


if __name__ == "__main__":
    key = jax.random.PRNGKey(0)
    k1, k2, k3, k4 = jax.random.split(key, 4)

    # Case 1: small shapes with a time-dim mismatch of 3 (<= tol 5 -> truncate).
    B, T_logits, T_targets, pos_weight = 2, 200, 197, 2.0
    logits = jax.random.normal(k1, (B, T_logits), dtype=jnp.float32)
    targets = (jax.random.uniform(k2, (B, T_targets)) > 0.7).astype(jnp.float32)

    loss = custom_bce_with_logits_loss(
        logits, targets, pos_weight=pos_weight, time_dim_mismatch_tol=5)
    loss = jax.block_until_ready(loss)

    min_len = min(T_logits, T_targets)
    ref = _reference_loss(logits[:, :min_len], targets[:, :min_len], pos_weight)
    ref = jax.block_until_ready(ref)
    assert jnp.allclose(loss, ref, rtol=1e-5, atol=1e-5), (loss, ref)

    # Case 2: force a multi-tile grid with ragged edges on both axes to
    # exercise the interior fast path AND the masked edge path.
    B2, T2 = 10, 300
    logits2 = jax.random.normal(k3, (B2, T2), dtype=jnp.float32)
    targets2 = (jax.random.uniform(k4, (B2, T2)) > 0.5).astype(jnp.float32)
    loss2 = custom_bce_with_logits_loss(
        logits2, targets2, pos_weight=1.5, block_rows=8, block_cols=128)
    loss2 = jax.block_until_ready(loss2)
    ref2 = _reference_loss(logits2, targets2, 1.5)
    assert jnp.allclose(loss2, ref2, rtol=1e-5, atol=1e-5), (loss2, ref2)

    # Case 3: equal shapes, pos_weight falsy (module maps it to "no weighting").
    loss3 = custom_bce_with_logits_loss(logits2, targets2, pos_weight=None)
    loss3 = jax.block_until_ready(loss3)
    ref3 = _reference_loss(logits2, targets2, None)
    assert jnp.allclose(loss3, ref3, rtol=1e-5, atol=1e-5), (loss3, ref3)

    print("KERNEL_OK")
</pallas_src>

<mosaic_0001>
module attributes {stable_mosaic.version = 11 : i64} {
  func.func @_bce_partial_kernel(%arg0: i32, %arg1: i32, %arg2: memref<1x1xf32, #tpu.memory_space<smem>>, %arg3: memref<8x256xf32, #tpu.memory_space<vmem>>, %arg4: memref<8x256xf32, #tpu.memory_space<vmem>>, %arg5: memref<1x256xf32, #tpu.memory_space<vmem>>) attributes {dimension_semantics = [#tpu.dimension_semantics<parallel>, #tpu.dimension_semantics<parallel>], iteration_bounds = array<i64: 1, 1>, scalar_prefetch = 0 : i64, scratch_operands = 0 : i64, tpu.core_type = #tpu.core_type<tc>, window_params = [{transform_indices = @transform_0, window_bounds = array<i64: 1, 1>}, {transform_indices = @transform_1, window_bounds = array<i64: 8, 256>}, {transform_indices = @transform_2, window_bounds = array<i64: 8, 256>}, {transform_indices = @transform_3, window_bounds = array<i64: 1, 256>}]} {
    %c0 = arith.constant 0 : index
    %c0_0 = arith.constant 0 : index
    %0 = memref.load %arg2[%c0, %c0_0] : memref<1x1xf32, #tpu.memory_space<smem>>
    %cst = arith.constant 1.000000e+00 : f32
    %1 = arith.subf %0, %cst : f32
    %c1_i32 = arith.constant 1 : i32
    %2 = arith.addi %arg0, %c1_i32 : i32
    %c8_i32 = arith.constant 8 : i32
    %3 = arith.muli %2, %c8_i32 : i32
    %c2_i32 = arith.constant 2 : i32
    %4 = arith.cmpi sle, %3, %c2_i32 : i32
    %c1_i32_1 = arith.constant 1 : i32
    %5 = arith.addi %arg1, %c1_i32_1 : i32
    %c256_i32 = arith.constant 256 : i32
    %6 = arith.muli %5, %c256_i32 : i32
    %c197_i32 = arith.constant 197 : i32
    %7 = arith.cmpi sle, %6, %c197_i32 : i32
    %8 = arith.andi %4, %7 : i1
    %9 = arith.extui %8 : i1 to i32
    %c0_i32 = arith.constant 0 : i32
    %10 = arith.cmpi ne, %9, %c0_i32 : i32
    scf.if %10 {
      %c0_3 = arith.constant 0 : index
      %c0_4 = arith.constant 0 : index
      %14 = vector.load %arg3[%c0_3, %c0_4] : memref<8x256xf32, #tpu.memory_space<vmem>>, vector<8x256xf32>
      %c0_5 = arith.constant 0 : index
      %c0_6 = arith.constant 0 : index
      %15 = vector.load %arg4[%c0_5, %c0_6] : memref<8x256xf32, #tpu.memory_space<vmem>>, vector<8x256xf32>
      %cst_7 = arith.constant 0.000000e+00 : f32
      %16 = vector.broadcast %cst_7 : f32 to vector<8x256xf32>
      %17 = arith.maximumf %14, %16 : vector<8x256xf32>
      %18 = math.absf %14 : vector<8x256xf32>
      %cst_8 = arith.constant 0.000000e+00 : f32
      %19 = vector.broadcast %cst_8 : f32 to vector<8x256xf32>
      %20 = arith.subf %19, %18 : vector<8x256xf32>
      %21 = math.exp %20 : vector<8x256xf32>
      %22 = math.log1p %21 : vector<8x256xf32>
      %23 = arith.addf %17, %22 : vector<8x256xf32>
      %24 = vector.broadcast %1 : f32 to vector<8x256xf32>
      %25 = arith.mulf %24, %15 : vector<8x256xf32>
      %cst_9 = arith.constant 1.000000e+00 : f32
      %26 = vector.broadcast %cst_9 : f32 to vector<8x256xf32>
      %27 = arith.addf %26, %25 : vector<8x256xf32>
      %28 = arith.mulf %23, %27 : vector<8x256xf32>
      %29 = arith.mulf %14, %15 : vector<8x256xf32>
      %30 = vector.broadcast %0 : f32 to vector<8x256xf32>
      %31 = arith.mulf %30, %29 : vector<8x256xf32>
      %32 = arith.subf %28, %31 : vector<8x256xf32>
      %cst_10 = arith.constant dense<0.000000e+00> : vector<256xf32>
      %33 = vector.multi_reduction <add>, %32, %cst_10 [0] : vector<8x256xf32> to vector<256xf32>
      %34 = vector.shape_cast %33 : vector<256xf32> to vector<1x256xf32>
      %c0_11 = arith.constant 0 : index
      %c0_12 = arith.constant 0 : index
      %35 = vector.load %arg5[%c0_11, %c0_12] : memref<1x256xf32, #tpu.memory_space<vmem>>, vector<1x256xf32>
      tpu.vector_store %arg5[%c0_11, %c0_12], %34 {strides = array<i32>} : memref<1x256xf32, #tpu.memory_space<vmem>>, vector<1x256xf32>,
    } else {
    }
    %true = arith.constant true
    %11 = arith.xori %8, %true : i1
    %12 = arith.extui %11 : i1 to i32
    %c0_i32_2 = arith.constant 0 : i32
    %13 = arith.cmpi ne, %12, %c0_i32_2 : i32
    scf.if %13 {
      %c8_i32_3 = arith.constant 8 : i32
      %14 = arith.muli %arg0, %c8_i32_3 : i32
      %15 = tpu.iota {dimensions = array<i32: 0>} : vector<8x1xi32>
      %16 = vector.broadcast %14 : i32 to vector<8x1xi32>
      %17 = arith.addi %16, %15 : vector<8x1xi32>
      %c256_i32_4 = arith.constant 256 : i32
      %18 = arith.muli %arg1, %c256_i32_4 : i32
      %19 = tpu.iota {dimensions = array<i32: 1>} : vector<1x256xi32>
      %20 = vector.broadcast %18 : i32 to vector<1x256xi32>
      %21 = arith.addi %20, %19 : vector<1x256xi32>
      %c2_i32_5 = arith.constant 2 : i32
      %22 = vector.broadcast %c2_i32_5 : i32 to vector<8x1xi32>
      %23 = arith.cmpi slt, %17, %22 : vector<8x1xi32>
      %c197_i32_6 = arith.constant 197 : i32
      %24 = vector.broadcast %c197_i32_6 : i32 to vector<1x256xi32>
      %25 = arith.cmpi slt, %21, %24 : vector<1x256xi32>
      %26 = vector.broadcast %23 : vector<8x1xi1> to vector<8x256xi1>
      %27 = vector.broadcast %25 : vector<1x256xi1> to vector<8x256xi1>
      %28 = arith.andi %26, %27 : vector<8x256xi1>
      %c0_7 = arith.constant 0 : index
      %c0_8 = arith.constant 0 : index
      %29 = vector.load %arg3[%c0_7, %c0_8] : memref<8x256xf32, #tpu.memory_space<vmem>>, vector<8x256xf32>
      %c0_9 = arith.constant 0 : index
      %c0_10 = arith.constant 0 : index
      %30 = vector.load %arg4[%c0_9, %c0_10] : memref<8x256xf32, #tpu.memory_space<vmem>>, vector<8x256xf32>
      %cst_11 = arith.constant 0.000000e+00 : f32
      %31 = vector.broadcast %cst_11 : f32 to vector<8x256xf32>
      %32 = arith.maximumf %29, %31 : vector<8x256xf32>
      %33 = math.absf %29 : vector<8x256xf32>
      %cst_12 = arith.constant 0.000000e+00 : f32
      %34 = vector.broadcast %cst_12 : f32 to vector<8x256xf32>
      %35 = arith.subf %34, %33 : vector<8x256xf32>
      %36 = math.exp %35 : vector<8x256xf32>
      %37 = math.log1p %36 : vector<8x256xf32>
      %38 = arith.addf %32, %37 : vector<8x256xf32>
      %39 = vector.broadcast %1 : f32 to vector<8x256xf32>
      %40 = arith.mulf %39, %30 : vector<8x256xf32>
      %cst_13 = arith.constant 1.000000e+00 : f32
      %41 = vector.broadcast %cst_13 : f32 to vector<8x256xf32>
      %42 = arith.addf %41, %40 : vector<8x256xf32>
      %43 = arith.mulf %38, %42 : vector<8x256xf32>
      %44 = arith.mulf %29, %30 : vector<8x256xf32>
      %45 = vector.broadcast %0 : f32 to vector<8x256xf32>
      %46 = arith.mulf %45, %44 : vector<8x256xf32>
      %47 = arith.subf %43, %46 : vector<8x256xf32>
      %cst_14 = arith.constant 0.000000e+00 : f32
      %48 = vector.broadcast %cst_14 : f32 to vector<8x256xf32>
      %49 = arith.select %28, %47, %48 : vector<8x256xi1>, vector<8x256xf32>
      %cst_15 = arith.constant dense<0.000000e+00> : vector<256xf32>
      %50 = vector.multi_reduction <add>, %49, %cst_15 [0] : vector<8x256xf32> to vector<256xf32>
      %51 = vector.shape_cast %50 : vector<256xf32> to vector<1x256xf32>
      %c0_16 = arith.constant 0 : index
      %c0_17 = arith.constant 0 : index
      %52 = vector.load %arg5[%c0_16, %c0_17] : memref<1x256xf32, #tpu.memory_space<vmem>>, vector<1x256xf32>
      tpu.vector_store %arg5[%c0_16, %c0_17], %51 {strides = array<i32>} : memref<1x256xf32, #tpu.memory_space<vmem>>, vector<1x256xf32>,
    } else {
    }
    return
  }
  func.func @transform_0(%arg0: i32, %arg1: i32) -> (i32, i32) {
    %c0_i32 = arith.constant 0 : i32
    %c0_i32_0 = arith.constant 0 : i32
    %c0_i32_1 = arith.constant 0 : i32
    return %c0_i32, %c0_i32_0 : i32, i32
  }
  func.func @transform_1(%arg0: i32, %arg1: i32) -> (i32, i32) {
    %c0_i32 = arith.constant 0 : i32
    return %arg0, %arg1 : i32, i32
  }
  func.func @transform_2(%arg0: i32, %arg1: i32) -> (i32, i32) {
    %c0_i32 = arith.constant 0 : i32
    return %arg0, %arg1 : i32, i32
  }
  func.func @transform_3(%arg0: i32, %arg1: i32) -> (i32, i32) {
    %c0_i32 = arith.constant 0 : i32
    return %arg0, %arg1 : i32, i32
  }
}

</mosaic_0001>

<bundles_post_ra>
// kernel: tpu_custom_call.1
= control target key start
LH: loop header
LB: loop body
LE: loop exit
PB: predicated region body
PF: predicated region fallthrough
CT: control target
= control target key end

     0   :  { %9 = vsyncpa [#allocation4], 0  ;;  %s596_s0 = inlined_call_operand.<no memory space> [shape: f32[1,1], index: 0, kind: input, shape index: {}]   ;;  %s597_s1 = inlined_call_operand.hbm [shape: f32[2,200], index: 1, kind: input, shape index: {}]   ;;  %s598_s2 = inlined_call_operand.hbm [shape: f32[2,197], index: 2, kind: input, shape index: {}]   ;;  %s599_s3 = inlined_call_operand.hbm [shape: f32[1,256], index: 3, kind: output, shape index: {}]  }
   0x1   :  { %10 = vsyncpa [#allocation7], 0 }
   0x2   :  { %11 = vsyncpa [#allocation5], 0 }
   0x3   :  { %18 = vsyncadd [#allocation4], 192  ;;  %s496_s12 = smov [#allocation3]  }
   0x4   :  { %s19_s13 = sshll.u32 %s496_s12, 4  ;;  %s20_s13 = int_to_ptr.vmem [resolvable:$true] %s19_s13 }
   0x5   :  { %s438_s14 = scalar_lea.vmem %s20_s13, 64  ;;  %s442_s15 = scalar_lea.vmem %s20_s13, 256 }
   0x6   :  { %p439_p0 = scmp.ne.s32.totalorder %s20_s13, %s438_s14  ;;  %p443_p1 = scmp.lt.s32.totalorder %s20_s13, %s20_s13 }
   0x7   :  { %p444_p2 = scmp.lt.s32.totalorder %s442_s15, %s438_s14 }
   0x9   :  { %p445_p3 = por %p444_p2, %p443_p1 }
   0xb   :  { %p446_p4 = pnand %p445_p3, %p439_p0 }
   0xd   :  { %449 = shalt.err (!%p446_p4)
}
   0xe   :  { %s497_s16 = smov 64   ;;  %s498_s17 = smov 4  }
   0xf   :  { %25 = dma.hbm_to_vmem [thread:$0]  %s597_s1, 64, %s20_s13, [#allocation4], %s497_s16, %s497_s16, %s498_s17  }
  0x10   :  { %30 = vsyncadd [#allocation7], 192  ;;  %s499_s20 = smov [#allocation6]  }
  0x11   :  { %s31_s21 = sshll.u32 %s499_s20, 4  ;;  %s32_s21 = int_to_ptr.vmem [resolvable:$true] %s31_s21 }
  0x12   :  { %s458_s22 = scalar_lea.vmem %s32_s21, 64  ;;  %s462_s23 = scalar_lea.vmem %s32_s21, 256 }
  0x13   :  { %p459_p5 = scmp.ne.s32.totalorder %s32_s21, %s458_s22  ;;  %p463_p6 = scmp.lt.s32.totalorder %s32_s21, %s32_s21 }
  0x14   :  { %p464_p7 = scmp.lt.s32.totalorder %s462_s23, %s458_s22 }
  0x16   :  { %p465_p8 = por %p464_p7, %p463_p6 }
  0x18   :  { %p466_p9 = pnand %p465_p8, %p459_p5 }
  0x1a   :  { %469 = shalt.err (!%p466_p9)
}
  0x1b   :  { %37 = dma.hbm_to_vmem [thread:$0]  %s598_s2, 64, %s32_s21, [#allocation7], %s497_s16, %s497_s16, %s498_s17  }
  0x1c   :  { %490 = dma.done.wait [#allocation4], 256  }
  0x1d   :  { %491 = vsyncadd [#allocation4], 4294967040 }
  0x1e   :  { %492 = dma.done.wait [#allocation7], 256  }
  0x1f   :  { %493 = vsyncadd [#allocation7], 4294967040  ;;  %v529_v0 = vld [vmem:[#allocation3] sm:$0xf]  ;;  %v531_v1 = vld [vmem:[#allocation3 + $0x4] sm:$0xf]  ;;  %v213_v24 = vlaneseq  ;;  %v320_v35 = vstv %s596_s0 }
  0x20   :  { %v533_v2 = vld [vmem:[#allocation3 + $0x8] sm:$0xf]  ;;  %v535_v3 = vld [vmem:[#allocation3 + $0xc] sm:$0xf]  ;;  %v247_v4 = vand.u32 2147483647, %v529_v0 }
  0x21   :  { %v248_v5 = vand.u32 2147483647, %v531_v1  ;;  %v249_v6 = vand.u32 2147483647, %v533_v2  ;;  %v250_v7 = vand.u32 2147483647, %v535_v3 }
  0x22   :  { %v251_v8 = vsub.f32 0.0, %v247_v4  ;;  %s406_s26 = sadd.f32 -1.0, %s596_s0  ;;  %v500_v26 = vmov 1983009808   ;;  %v239_v28 = vld [vmem:[#allocation6] sm:$0xf] }
  0x23   :  { %v252_v9 = vsub.f32 0.0, %v248_v5  ;;  %v253_v10 = vsub.f32 0.0, %v249_v6  ;;  %v254_v11 = vsub.f32 0.0, %v250_v7  ;;  %v547_v27 = vunpack.c.l.s4 %v500_v26  ;;  %v240_v31 = vld [vmem:[#allocation6 + $0x4] sm:$0xf]  ;;  %s502_s0 = smov [#allocation8]  }
  0x24   :  { %v255_v12 = vmul.f32 1.442695, %v251_v8  ;;  %v303_v30 = vstv %s406_s26  ;;  %v550_v33 = vshrl.u32 %v213_v24, 7  ;;  %v553_v34 = vand.u32 127, %v213_v24  ;;  %v241_v36 = vld [vmem:[#allocation6 + $0x8] sm:$0xf] }
  0x25   :  { %v257_v13 = vmul.f32 1.442695, %v252_v9  ;;  %v259_v14 = vmul.f32 1.442695, %v253_v10  ;;  %v261_v15 = vmul.f32 1.442695, %v254_v11  ;;  %v304_v39 = vmul.f32 %v303_v30, %v239_v28 }
  0x26   :  { %414 = vpow2.f32 %v255_v12  ;;  %v337_v40 = vunpack.c.0.s8 %v547_v27  ;;  %v242_v41 = vld [vmem:[#allocation6 + $0xc] sm:$0xf]  ;;  %v305_v44 = vmul.f32 %v303_v30, %v240_v31  ;;  %v316_v45 = vmul.f32 %v239_v28, %v529_v0  ;;  %s396_s29 = sshll.u32 %s502_s0, 4  ;;  %s397_s29 = int_to_ptr.vmem [resolvable:$true] %s396_s29 }
  0x27   :  { %416 = vpow2.f32 %v257_v13  ;;  %v243_v46 = vmax.f32 %v529_v0, 0.0  ;;  %v244_v47 = vmax.f32 %v531_v1, 0.0  ;;  %v245_v50 = vmax.f32 %v533_v2, 0.0  ;;  %s470_s30 = scalar_lea.vmem %s397_s29, 32  ;;  %p475_p11 = scmp.lt.s32.totalorder %s397_s29, %s397_s29 }
  0x28   :  { %418 = vpow2.f32 %v259_v14  ;;  %v246_v51 = vmax.f32 %v535_v3, 0.0  ;;  %v306_v53 = vmul.f32 %v303_v30, %v241_v36  ;;  %v307_v56 = vmul.f32 %v303_v30, %v242_v41  ;;  %p471_p10 = scmp.ne.s32.totalorder %s397_s29, %s470_s30  ;;  %p476_p12 = scmp.lt.s32.totalorder %s470_s30, %s470_s30 }
  0x29   :  { %420 = vpow2.f32 %v261_v15  ;;  %v308_v57 = vadd.f32 1.0, %v304_v39  ;;  %v309_v62 = vadd.f32 1.0, %v305_v44  ;;  %v317_v6 = vmul.f32 %v240_v31, %v531_v1 }
  0x2a   :  { %v310_v10 = vadd.f32 1.0, %v306_v53  ;;  %v318_v11 = vmul.f32 %v241_v36, %v533_v2  ;;  %v319_v15 = vmul.f32 %v242_v41, %v535_v3  ;;  %v220_v36 = vadd.s32 128, %v553_v34  ;;  %p477_p13 = por %p476_p12, %p475_p11 }
  0x2b   :  { %v340_v39 = vsub.s32 %v337_v40, %v550_v33  ;;  %vm224_vm4 = vcmp.lt.s32.totalorder %v550_v33, 2  ;;  %vm387_vm7 = vcmp.lt.s32.totalorder %v213_v24, 256 }
  0x2c   :  { %v323_v27 = vmul.f32 %v320_v35, %v318_v11  ;;  %v324_v30 = vmul.f32 %v320_v35, %v319_v15  ;;  %vm226_vm5 = vcmp.lt.s32.totalorder %v220_v36, 197  ;;  %p478_p0 = pnand %p477_p13, %p471_p10 }
  0x2d   :  { %vm234_vm6 = vmand %vm224_vm4, %vm226_vm5 }
  0x33   :  { %v415_v16 = vpop.eup %414 }
  0x34   :  { %v417_v17 = vpop.eup %416  ;;  %v263_v18 = vadd.f32 1.0, %v415_v16  ;;  %v266_v25 = vmul.f32 -0.5, %v415_v16  ;;  %v269_v42 = vand.u32 2147483647, %v415_v16 }
  0x35   :  { %v419_v19 = vpop.eup %418  ;;  %v272_v20 = vadd.f32 1.0, %v417_v17  ;;  %v275_v29 = vmul.f32 -0.5, %v417_v17  ;;  %v278_v48 = vand.u32 2147483647, %v417_v17 }
  0x36   :  { %v541_v21 = vpop.eup %420  ;;  %422 = vlog2.f32 %v263_v18  ;;  %v281_v22 = vadd.f32 1.0, %v419_v19  ;;  %v284_v32 = vmul.f32 -0.5, %v419_v19  ;;  %v267_v37 = vadd.f32 1.0, %v266_v25 }
  0x37   :  { %424 = vlog2.f32 %v272_v20  ;;  %v290_v23 = vadd.f32 1.0, %v541_v21  ;;  %v293_v38 = vmul.f32 -0.5, %v541_v21  ;;  %v276_v43 = vadd.f32 1.0, %v275_v29 }
  0x38   :  { %426 = vlog2.f32 %v281_v22  ;;  %v285_v49 = vadd.f32 1.0, %v284_v32  ;;  %v287_v52 = vand.u32 2147483647, %v419_v19  ;;  %v268_v54 = vmul.f32 %v415_v16, %v267_v37 }
  0x39   :  { %428 = vlog2.f32 %v290_v23  ;;  %v294_v55 = vadd.f32 1.0, %v293_v38  ;;  %vm565_vm0 = vcmp.lt.f32.partialorder %v269_v42, 0.0004427343  ;;  %v277_v60 = vmul.f32 %v417_v17, %v276_v43 }
  0x3a   :  { %v296_v61 = vand.u32 2147483647, %v541_v21  ;;  %vm570_vm1 = vcmp.lt.f32.partialorder %v278_v48, 0.0004427343  ;;  %v286_v5 = vmul.f32 %v419_v19, %v285_v49  ;;  %vm575_vm2 = vcmp.lt.f32.partialorder %v287_v52, 0.0004427343 }
  0x3b   :  { %v295_v14 = vmul.f32 %v541_v21, %v294_v55  ;;  %v321_v18 = vmul.f32 %v320_v35, %v316_v45  ;;  %v322_v22 = vmul.f32 %v320_v35, %v317_v6  ;;  %v311_v25 = vadd.f32 1.0, %v307_v56 }
  0x3c   :  { %vm297_vm3 = vcmp.lt.f32.partialorder %v296_v61, 0.0004427343  ;;  %v501_v52 = vmov 1966171168  }
  0x3d   :  { %v371_v53 = vunpack.c.l.s4 %v501_v52 }
  0x43   :  { %v423_v58 = vpop.eup %422 }
  0x44   :  { %v425_v63 = vpop.eup %424  ;;  %v265_v0 = vmul.f32 0.6931472, %v423_v58 }
  0x45   :  { %v427_v7 = vpop.eup %426  ;;  %v274_v8 = vmul.f32 0.6931472, %v425_v63 }
  0x46   :  { %v271_v12 = vsel %vm565_vm0, %v268_v54, %v265_v0  ;;  %v283_v13 = vmul.f32 0.6931472, %v427_v7  ;;  %v429_v16 = vpop.eup %428 }
  0x47   :  { %v280_v1 = vsel %vm570_vm1, %v277_v60, %v274_v8  ;;  %v299_v17 = vadd.f32 %v271_v12, %v243_v46  ;;  %v292_v20 = vmul.f32 0.6931472, %v429_v16 }
  0x48   :  { %v289_v19 = vsel %vm575_vm2, %v286_v5, %v283_v13  ;;  %v300_v2 = vadd.f32 %v280_v1, %v244_v47 }
  0x49   :  { %v301_v23 = vadd.f32 %v289_v19, %v245_v50  ;;  %v312_v26 = vmul.f32 %v308_v57, %v299_v17  ;;  %v298_v21 = vsel %vm297_vm3, %v295_v14, %v292_v20  ;;  %v372_v57 = vunpack.c.0.s8 %v371_v53 }
  0x4a   :  { %v313_v28 = vmul.f32 %v309_v62, %v300_v2  ;;  %v302_v3 = vadd.f32 %v298_v21, %v246_v51 }
  0x4b   :  { %v314_v29 = vmul.f32 %v310_v10, %v301_v23  ;;  %v325_v31 = vsub.f32 %v312_v26, %v321_v18  ;;  %v375_v62 = vsub.s32 %v372_v57, %v550_v33 }
  0x4c   :  { %v326_v32 = vsub.f32 %v313_v28, %v322_v22  ;;  %v315_v37 = vmul.f32 %v311_v25, %v302_v3 }
  0x4d   :  { %v327_v38 = vsub.f32 %v314_v29, %v323_v27 }
  0x4e   :  { %v333_v41 = vcombine.low %v325_v31, %v326_v32  ;;  %v328_v42 = vsub.f32 %v315_v37, %v324_v30 }
  0x50   :  { %v334_v43 = vcombine.low %v327_v38, %v328_v42  ;;  %v341_v44 = vrot.slane %v333_v41, %v340_v39 }
  0x52   :  { %v348_v45 = vrot.slane %v334_v43, %v340_v39 }
  0x54   :  { %v349_v46 = vcombine.low %v341_v44, %v348_v45  ;;  %v350_v47 = vcombine.high %v341_v44, %v348_v45 }
  0x56   :  { %v353_v35 = vsel %vm224_vm4, %v349_v46, 0.0  ;;  %v354_v48 = vsel %vm234_vm6, %v350_v47, 0.0 }
  0x57   :  { %v355_v49 = vrot.slane %v353_v35, 4  ;;  %v361_v50 = vrot.slane %v354_v48, 4 }
  0x59   :  { %v356_v34 = vadd.f32 %v355_v49, %v353_v35  ;;  %v362_v51 = vadd.f32 %v361_v50, %v354_v48 }
  0x5b   :  { %v357_v40 = vrot.slane %v356_v34, 2  ;;  %v363_v54 = vrot.slane %v362_v51, 2 }
  0x5d   :  { %v358_v55 = vadd.f32 %v357_v40, %v356_v34  ;;  %v364_v56 = vadd.f32 %v363_v54, %v362_v51 }
  0x5f   :  { %v359_v58 = vrot.slane %v358_v55, 1  ;;  %v365_v59 = vrot.slane %v364_v56, 1 }
  0x61   :  { %v360_v60 = vadd.f32 %v359_v58, %v358_v55  ;;  %v366_v61 = vadd.f32 %v365_v59, %v364_v56 }
  0x63   :  { %v369_v63 = vcombine.low %v360_v60, %v366_v61 }
  0x65   :  { %v376_v0 = vrot.slane %v369_v63, %v375_v62 }
  0x67   :  { %v383_v4 = vrot.slane %v376_v0, %v375_v62 }
  0x69   :  { %389 = vst.msk [vmem:[#allocation8] sm:$0x3] %vm387_vm7, %v383_v4 }
  0x6a   :  { %481 = shalt.err (!%p478_p0)
}
  0x6b   :  { %399 = dma.vmem_to_hbm [thread:$0]  %s397_s29, 32, %s599_s3, [#allocation5]  }
  0x6c   :  { %494 = dma.done.wait [#allocation5], 32  }
  0x6d   :  { %495 = vsyncadd [#allocation5], 4294967264 }
  0x6e   :  { %403 = vsyncpa [#allocation4], 1 }
  0x6f   :  { %404 = vsyncpa [#allocation7], 1 }
  0x70   :  { %405 = vsyncpa [#allocation5], 1 }

</bundles_post_ra>
